<compile_context>
chip_gen: v7x
topology: tpu7x:2x2x1
jax: 0.10.0
libtpu: 0.0.40
codegen_flags: <defaults>
</compile_context>

<pallas_src>
import jax
import jax.numpy as jnp
from jax.experimental import pallas as pl
from jax.experimental.pallas import tpu as pltpu


def attn_gate_kernel(g_ref, x_ref, wg_ref, wx_ref, cp_ref, bpsi_ref, o_ref):
    # Blocks (channels on sublanes, pixels on lanes):
    #   g_ref : (1, F_g, T)      x_ref : (1, F_l, T)     (I/O dtype)
    #   wg_ref: (F_int, F_g) f32 wx_ref: (F_int, F_l) f32
    #   cp_ref: (F_int, 2) f32   col 0 = bg+bx (BN folded), col 1 = w_psi (BN folded)
    #   bpsi_ref: (1,) f32 in SMEM
    g = g_ref[0].astype(jnp.float32)                 # (F_g, T), in-kernel cast
    x = x_ref[0]                                     # (F_l, T), I/O dtype
    xf = x.astype(jnp.float32)

    # a = relu(Wg @ g + Wx @ x + (bg + bx))  -> (F_int, T), fp32 accumulation.
    a = jnp.dot(wg_ref[...], g, preferred_element_type=jnp.float32)
    a = a + jnp.dot(wx_ref[...], xf, preferred_element_type=jnp.float32)
    a = jnp.maximum(a + cp_ref[:, 0:1], 0.0)

    # psi = sigmoid(w_psi . a + b_psi): VPU multiply + sublane reduce (MXU idle
    # anyway in this mem-bound kernel; revisit only if VALU/XLU slots saturate).
    logit = jnp.sum(a * cp_ref[:, 1:2], axis=0, keepdims=True) + bpsi_ref[0]
    psi = jax.nn.sigmoid(logit)                      # (1, T)

    o_ref[0] = (xf * psi).astype(o_ref.dtype)        # gate x, lane-dense store


def fold_bn(w, b, gamma, beta, mean, var, eps=1e-5):
    # conv(1x1) out channel c: y_c = sum_k w[c,k]*in_k + b[c]
    # BN eval:  gamma*(y - mean)/sqrt(var+eps) + beta
    scale = gamma / jnp.sqrt(var + eps)              # (C_out,)
    return w * scale[:, None], scale * (b - mean) + beta


def _round_up(a, m):
    return (a + m - 1) // m * m


def _cdiv(a, b):
    return (a + b - 1) // b


def _half_tile(tm):
    # Halve a lane tile while keeping it a multiple of 128.
    return max(128, (tm // 2) // 128 * 128)


def _sublane_pad(c, dtype):
    # Channel count as stored in VMEM (sublane packing: 8 f32 / 16 bf16 / 32 i8).
    itemsize = jnp.dtype(dtype).itemsize
    return _round_up(c, 8 * max(1, 4 // itemsize))


def _working_set_bytes(tm, F_g, F_l, F_int, g_dtype, x_dtype):
    g_bytes = _sublane_pad(F_g, g_dtype) * jnp.dtype(g_dtype).itemsize
    x_bytes = _sublane_pad(F_l, x_dtype) * jnp.dtype(x_dtype).itemsize
    streamed = 2 * tm * (g_bytes + 2 * x_bytes)      # double-buffered g, x, out
    interm = 2 * tm * _round_up(F_int, 8) * 4        # fp32 `a` + second dot result
    return streamed + interm + (1 << 20)             # weights / bookkeeping margin


def attn_gating_block(g, x, params, *, tile_cols=2048):
    """g: (N, F_g, H, W), x: (N, F_l, H, W)  — NCHW, PyTorch convention.

    Output dtype follows x.dtype; compute is fp32 inside (weights kept fp32).
    bf16 I/O halves HBM traffic and is recommended on all generations
    (v5e/v6e/v7x) — this kernel is HBM-bandwidth-bound.
    """
    N, F_g, H, W = g.shape
    _, F_l, _, _ = x.shape
    io_dtype = x.dtype

    # Fold eval-mode BN into the 1x1 conv weights/biases (host-side, tiny).
    wg, bg = fold_bn(params["wg"], params["bg"], *params["bn_g"])
    wx, bx = fold_bn(params["wx"], params["bx"], *params["bn_x"])
    wp, bp = fold_bn(params["wpsi"], params["bpsi"], *params["bn_psi"])
    F_int = wg.shape[0]

    # NCHW kept as-is; collapse spatial dims (free, contiguous reshape) so pixels
    # land on the lane axis.  No pad, no cast -> no extra HBM passes.
    hw = H * W
    g3 = g.reshape(N, F_g, hw)
    x3 = x.reshape(N, F_l, hw)

    # Generation-aware VMEM budget (v7x has 64 MiB/TC, v5e/v6e have 128 MiB).
    try:
        info = pltpu.get_tpu_info()
        vmem_cap = int(getattr(info, "vmem_capacity_bytes", 128 * 1024 * 1024))
    except Exception:
        vmem_cap = 128 * 1024 * 1024
    small_vmem = vmem_cap <= 64 * 1024 * 1024
    vmem_limit = (36 if small_vmem else 48) * 1024 * 1024
    shrink_threshold = (20 if small_vmem else 40) * 1024 * 1024

    # Lane tile: multiple of 128 (or full hw when hw < 128), capped at tile_cols.
    if hw >= 128:
        tm = min(_round_up(tile_cols, 128), (hw // 128) * 128)
    else:
        tm = hw  # block last dim == full array dim (allowed)

    # Never shrink below 1024 unless VMEM truly requires it (per-step overhead).
    while tm > 1024 and _working_set_bytes(tm, F_g, F_l, F_int, g.dtype, io_dtype) > shrink_threshold:
        tm = _half_tile(tm)
    while tm > 256 and _working_set_bytes(tm, F_g, F_l, F_int, g.dtype, io_dtype) > int(0.85 * vmem_limit):
        tm = _half_tile(tm)
    # v7x megacore: guarantee >=2 grid steps so both TensorCores get work.
    while N * _cdiv(hw, tm) < 2 and tm >= 2048:
        tm = _half_tile(tm)

    # Kernel-side constants (weights kept fp32: tiny, avoids bf16 quantization of
    # the BN-folded scales; activation tiles are cast inside the kernel).
    wg_k = wg.astype(jnp.float32)                                  # (F_int, F_g)
    wx_k = wx.astype(jnp.float32)                                  # (F_int, F_l)
    cparam = jnp.stack([(bg + bx).astype(jnp.float32),
                        wp[0].astype(jnp.float32)], axis=1)        # (F_int, 2)
    bpsi = bp.reshape(1).astype(jnp.float32)                       # (1,) scalar -> SMEM

    grid = (N, _cdiv(hw, tm))  # ragged last lane tile handled by boundary masking
    const = lambda n, i: (0, 0)
    # NOTE: pipeline_mode=pl.Buffered(3) on g/x could hide DMA issue latency for
    # very small tiles; omitted here (a few % at most in the small-tile regime).
    out = pl.pallas_call(
        attn_gate_kernel,
        out_shape=jax.ShapeDtypeStruct((N, F_l, hw), io_dtype),
        grid=grid,
        in_specs=[
            pl.BlockSpec((1, F_g, tm), lambda n, i: (n, 0, i)),    # g pixels
            pl.BlockSpec((1, F_l, tm), lambda n, i: (n, 0, i)),    # x pixels
            pl.BlockSpec((F_int, F_g), const),                     # Wg (BN folded, f32)
            pl.BlockSpec((F_int, F_l), const),                     # Wx (BN folded, f32)
            pl.BlockSpec((F_int, 2), const),                       # [bg+bx, wpsi]
            pl.BlockSpec(memory_space=pltpu.MemorySpace.SMEM),     # bpsi scalar
        ],
        out_specs=pl.BlockSpec((1, F_l, tm), lambda n, i: (n, 0, i)),
        compiler_params=pltpu.CompilerParams(
            dimension_semantics=("parallel", "parallel"),
            vmem_limit_bytes=vmem_limit),
    )(g3, x3, wg_k, wx_k, cparam, bpsi)

    return out.reshape(N, F_l, H, W)


def reference(g, x, params):
    """Plain-JAX reference of the PyTorch forward (eval-mode BN)."""
    wg, bg = fold_bn(params["wg"], params["bg"], *params["bn_g"])
    wx, bx = fold_bn(params["wx"], params["bx"], *params["bn_x"])
    wp, bp = fold_bn(params["wpsi"], params["bpsi"], *params["bn_psi"])
    g1 = jnp.einsum("nchw,oc->nohw", g, wg) + bg[None, :, None, None]
    x1 = jnp.einsum("nchw,oc->nohw", x, wx) + bx[None, :, None, None]
    a = jnp.maximum(g1 + x1, 0.0)
    logit = jnp.einsum("nchw,oc->nohw", a, wp) + bp[None, :, None, None]
    return x * jax.nn.sigmoid(logit)


def make_params(key, F_g, F_l, F_int):
    ks = jax.random.split(key, 6)
    return {
        "wg": 0.1 * jax.random.normal(ks[0], (F_int, F_g), jnp.float32),
        "bg": 0.1 * jax.random.normal(ks[1], (F_int,), jnp.float32),
        "wx": 0.1 * jax.random.normal(ks[2], (F_int, F_l), jnp.float32),
        "bx": 0.1 * jax.random.normal(ks[3], (F_int,), jnp.float32),
        "wpsi": 0.1 * jax.random.normal(ks[4], (1, F_int), jnp.float32),
        "bpsi": 0.1 * jax.random.normal(ks[5], (1,), jnp.float32),
        # BN (gamma, beta, running_mean, running_var) — eval mode.
        # TODO(synk): training-mode BN (batch-statistic update) not implemented.
        "bn_g": (jnp.linspace(0.9, 1.1, F_int), jnp.linspace(-0.1, 0.1, F_int),
                 jnp.linspace(-0.05, 0.05, F_int), jnp.linspace(0.8, 1.2, F_int)),
        "bn_x": (jnp.linspace(1.1, 0.9, F_int), jnp.linspace(0.1, -0.1, F_int),
                 jnp.linspace(0.05, -0.05, F_int), jnp.linspace(1.2, 0.8, F_int)),
        "bn_psi": (jnp.ones((1,)), jnp.zeros((1,)), jnp.zeros((1,)), jnp.ones((1,))),
    }


if __name__ == "__main__":
    key = jax.random.PRNGKey(0)
    kg, kx, kp = jax.random.split(key, 3)

    # Case 1: standard shapes, fp32 I/O.
    N, F_g, F_l, F_int, H, Wd = 2, 4, 4, 8, 16, 16
    g = jax.random.normal(kg, (N, F_g, H, Wd), jnp.float32)
    x = jax.random.normal(kx, (N, F_l, H, Wd), jnp.float32)
    params = make_params(kp, F_g, F_l, F_int)
    ref = reference(g, x, params)
    out = jax.block_until_ready(attn_gating_block(g, x, params))
    assert out.shape == x.shape and out.dtype == x.dtype
    assert jnp.allclose(out, ref, atol=1e-5, rtol=1e-5)

    # Case 2: bf16 I/O (recommended on all generations incl. v5e — halves HBM bytes).
    out_bf16 = jax.block_until_ready(
        attn_gating_block(g.astype(jnp.bfloat16), x.astype(jnp.bfloat16), params))
    assert out_bf16.dtype == jnp.bfloat16
    assert jnp.allclose(out_bf16.astype(jnp.float32), ref, atol=6e-2, rtol=6e-2)

    # Case 3: non-divisible H*W — exercises ragged last lane tile (no wrapper pad/slice).
    N2, H2, W2 = 1, 13, 19
    g2 = jax.random.normal(kg, (N2, F_g, H2, W2), jnp.float32)
    x2 = jax.random.normal(kx, (N2, F_l, H2, W2), jnp.float32)
    ref2 = reference(g2, x2, params)
    out2 = jax.block_until_ready(attn_gating_block(g2, x2, params))
    assert out2.shape == x2.shape
    assert jnp.allclose(out2, ref2, atol=1e-5, rtol=1e-5)

    # Case 4: mixed input dtypes (g bf16, x f32) — no wrapper-side cast pass over g.
    out_mixed = jax.block_until_ready(
        attn_gating_block(g.astype(jnp.bfloat16), x, params))
    assert out_mixed.dtype == x.dtype
    assert jnp.allclose(out_mixed, ref, atol=3e-2, rtol=3e-2)

    print("KERNEL_OK")
</pallas_src>

<mosaic_0001>
module attributes {stable_mosaic.version = 11 : i64} {
  func.func @attn_gate_kernel(%arg0: i32, %arg1: i32, %arg2: memref<1x4x256xf32, #tpu.memory_space<vmem>>, %arg3: memref<1x4x256xf32, #tpu.memory_space<vmem>>, %arg4: memref<8x4xf32, #tpu.memory_space<vmem>>, %arg5: memref<8x4xf32, #tpu.memory_space<vmem>>, %arg6: memref<8x2xf32, #tpu.memory_space<vmem>>, %arg7: memref<1xf32, #tpu.memory_space<smem>>, %arg8: memref<1x4x256xf32, #tpu.memory_space<vmem>>) attributes {dimension_semantics = [#tpu.dimension_semantics<parallel>, #tpu.dimension_semantics<parallel>], iteration_bounds = array<i64: 2, 1>, scalar_prefetch = 0 : i64, scratch_operands = 0 : i64, tpu.core_type = #tpu.core_type<tc>, window_params = [{transform_indices = @transform_0, window_bounds = array<i64: 1, 4, 256>}, {transform_indices = @transform_1, window_bounds = array<i64: 1, 4, 256>}, {pipeline_mode = #tpu.pipeline_mode<synchronous>, transform_indices = @transform_2, window_bounds = array<i64: 8, 4>}, {pipeline_mode = #tpu.pipeline_mode<synchronous>, transform_indices = @transform_3, window_bounds = array<i64: 8, 4>}, {pipeline_mode = #tpu.pipeline_mode<synchronous>, transform_indices = @transform_4, window_bounds = array<i64: 8, 2>}, {transform_indices = @transform_5, window_bounds = array<i64: 1>}, {transform_indices = @transform_6, window_bounds = array<i64: 1, 4, 256>}]} {
    %c0 = arith.constant 0 : index
    %c0_0 = arith.constant 0 : index
    %c0_1 = arith.constant 0 : index
    %0 = vector.load %arg2[%c0, %c0_0, %c0_1] : memref<1x4x256xf32, #tpu.memory_space<vmem>>, vector<1x4x256xf32>
    %1 = vector.shape_cast %0 : vector<1x4x256xf32> to vector<4x256xf32>
    %c0_2 = arith.constant 0 : index
    %c0_3 = arith.constant 0 : index
    %c0_4 = arith.constant 0 : index
    %2 = vector.load %arg3[%c0_2, %c0_3, %c0_4] : memref<1x4x256xf32, #tpu.memory_space<vmem>>, vector<1x4x256xf32>
    %3 = vector.shape_cast %2 : vector<1x4x256xf32> to vector<4x256xf32>
    %c0_5 = arith.constant 0 : index
    %c0_6 = arith.constant 0 : index
    %4 = vector.load %arg4[%c0_5, %c0_6] : memref<8x4xf32, #tpu.memory_space<vmem>>, vector<8x4xf32>
    %cst = arith.constant dense<0.000000e+00> : vector<8x256xf32>
    %5 = tpu.matmul %4, %1, %cst {dimension_numbers = #tpu.dot_dimension_numbers<[1], [0], [0], [1], [0, 0, 1, 1], [], []>} : vector<8x4xf32>, vector<4x256xf32>, vector<8x256xf32> -> vector<8x256xf32>
    %c0_7 = arith.constant 0 : index
    %c0_8 = arith.constant 0 : index
    %6 = vector.load %arg5[%c0_7, %c0_8] : memref<8x4xf32, #tpu.memory_space<vmem>>, vector<8x4xf32>
    %cst_9 = arith.constant dense<0.000000e+00> : vector<8x256xf32>
    %7 = tpu.matmul %6, %3, %cst_9 {dimension_numbers = #tpu.dot_dimension_numbers<[1], [0], [0], [1], [0, 0, 1, 1], [], []>} : vector<8x4xf32>, vector<4x256xf32>, vector<8x256xf32> -> vector<8x256xf32>
    %8 = arith.addf %5, %7 : vector<8x256xf32>
    %c0_10 = arith.constant 0 : index
    %c0_11 = arith.constant 0 : index
    %9 = vector.load %arg6[%c0_10, %c0_11] : memref<8x2xf32, #tpu.memory_space<vmem>>, vector<8x1xf32>
    %10 = vector.broadcast %9 : vector<8x1xf32> to vector<8x256xf32>
    %11 = arith.addf %8, %10 : vector<8x256xf32>
    %cst_12 = arith.constant 0.000000e+00 : f32
    %12 = vector.broadcast %cst_12 : f32 to vector<8x256xf32>
    %13 = arith.maximumf %11, %12 : vector<8x256xf32>
    %c0_13 = arith.constant 0 : index
    %c1 = arith.constant 1 : index
    %14 = vector.load %arg6[%c0_13, %c1] : memref<8x2xf32, #tpu.memory_space<vmem>>, vector<8x1xf32>
    %15 = vector.broadcast %14 : vector<8x1xf32> to vector<8x256xf32>
    %16 = arith.mulf %13, %15 : vector<8x256xf32>
    %cst_14 = arith.constant dense<0.000000e+00> : vector<256xf32>
    %17 = vector.multi_reduction <add>, %16, %cst_14 [0] : vector<8x256xf32> to vector<256xf32>
    %18 = vector.shape_cast %17 : vector<256xf32> to vector<1x256xf32>
    %c0_15 = arith.constant 0 : index
    %19 = memref.load %arg7[%c0_15] : memref<1xf32, #tpu.memory_space<smem>>
    %20 = vector.broadcast %19 : f32 to vector<1x256xf32>
    %21 = arith.addf %18, %20 : vector<1x256xf32>
    %22 = arith.negf %21 : vector<1x256xf32>
    %23 = math.exp %22 : vector<1x256xf32>
    %cst_16 = arith.constant 1.000000e+00 : f32
    %24 = vector.broadcast %cst_16 : f32 to vector<1x256xf32>
    %25 = arith.addf %24, %23 : vector<1x256xf32>
    %26 = arith.divf %24, %25 : vector<1x256xf32>
    %27 = vector.broadcast %26 : vector<1x256xf32> to vector<4x256xf32>
    %28 = arith.mulf %3, %27 : vector<4x256xf32>
    %c0_17 = arith.constant 0 : index
    %c0_18 = arith.constant 0 : index
    %c0_19 = arith.constant 0 : index
    %29 = vector.load %arg8[%c0_17, %c0_18, %c0_19] : memref<1x4x256xf32, #tpu.memory_space<vmem>>, vector<1x4x256xf32>
    %30 = vector.shape_cast %29 : vector<1x4x256xf32> to vector<4x256xf32>
    %31 = vector.shape_cast %28 : vector<4x256xf32> to vector<1x4x256xf32>
    tpu.vector_store %arg8[%c0_17, %c0_18, %c0_19], %31 {strides = array<i32>} : memref<1x4x256xf32, #tpu.memory_space<vmem>>, vector<1x4x256xf32>,
    return
  }
  func.func @transform_0(%arg0: i32, %arg1: i32) -> (i32, i32, i32) {
    %c0_i32 = arith.constant 0 : i32
    %c0_i32_0 = arith.constant 0 : i32
    return %arg0, %c0_i32, %arg1 : i32, i32, i32
  }
  func.func @transform_1(%arg0: i32, %arg1: i32) -> (i32, i32, i32) {
    %c0_i32 = arith.constant 0 : i32
    %c0_i32_0 = arith.constant 0 : i32
    return %arg0, %c0_i32, %arg1 : i32, i32, i32
  }
  func.func @transform_2(%arg0: i32, %arg1: i32) -> (i32, i32) {
    %c0_i32 = arith.constant 0 : i32
    %c0_i32_0 = arith.constant 0 : i32
    %c0_i32_1 = arith.constant 0 : i32
    return %c0_i32, %c0_i32_0 : i32, i32
  }
  func.func @transform_3(%arg0: i32, %arg1: i32) -> (i32, i32) {
    %c0_i32 = arith.constant 0 : i32
    %c0_i32_0 = arith.constant 0 : i32
    %c0_i32_1 = arith.constant 0 : i32
    return %c0_i32, %c0_i32_0 : i32, i32
  }
  func.func @transform_4(%arg0: i32, %arg1: i32) -> (i32, i32) {
    %c0_i32 = arith.constant 0 : i32
    %c0_i32_0 = arith.constant 0 : i32
    %c0_i32_1 = arith.constant 0 : i32
    return %c0_i32, %c0_i32_0 : i32, i32
  }
  func.func @transform_5(%arg0: i32, %arg1: i32) -> i32 {
    %c0_i32 = arith.constant 0 : i32
    %c0_i32_0 = arith.constant 0 : i32
    return %c0_i32 : i32
  }
  func.func @transform_6(%arg0: i32, %arg1: i32) -> (i32, i32, i32) {
    %c0_i32 = arith.constant 0 : i32
    %c0_i32_0 = arith.constant 0 : i32
    return %arg0, %c0_i32, %arg1 : i32, i32, i32
  }
}

</mosaic_0001>

<bundles_post_ra>
// kernel: tpu_custom_call.1
= control target key start
LH: loop header
LB: loop body
LE: loop exit
PB: predicated region body
PF: predicated region fallthrough
CT: control target
= control target key end

     0   :  { %s995_s0 = inlined_call_operand.vmem [shape: f32[2,4,256], index: 0, kind: input, shape index: {}]   ;;  %s996_s1 = inlined_call_operand.vmem [shape: f32[2,4,256], index: 1, kind: input, shape index: {}]   ;;  %s997_s2 = inlined_call_operand.vmem [shape: f32[8,4], index: 2, kind: input, shape index: {}]   ;;  %s998_s3 = inlined_call_operand.vmem [shape: f32[8,4], index: 3, kind: input, shape index: {}]   ;;  %s999_s4 = inlined_call_operand.vmem [shape: f32[8,2], index: 4, kind: input, shape index: {}]   ;;  %s1000_s5 = inlined_call_operand.<no memory space> [shape: f32[1], index: 5, kind: input, shape index: {}]   ;;  %s1001_s6 = inlined_call_operand.hbm [shape: f32[2,4,256], index: 6, kind: output, shape index: {}]  }
   0x1   :  { %11 = sst [smem:[#allocation2]] %s1000_s5 }
   0x2   :  { %12 = vsyncpa [#allocation4], 0 }
   0x3   :  { %14 = vsyncpa [#allocation4 + $0x1], 0  ;;  %s865_s23 = smov 0   ;;  %s867_s24 = smov 0  }
   0x4   :  { %s869_s25 = smov 0   ;;  %s871_s26 = smov 0  }
   0x5   :  { %s873_s27 = smov 0   ;;  %s875_s28 = smov 0  }
   0x6 LB: > { %s645_s5 = sadd.s32 4294967295, %s821_s28   ;;  %s646_s29 = sadd.s32 4294967294, %s821_s28   ;;  %s821_s28 = sphi %s875_s28, %s20_s28   ;;  %s817_s27 = sphi %s873_s27, %s1008_s27   ;;  %s813_s26 = sphi %s871_s26, %s1007_s26   ;;  %s809_s25 = sphi %s869_s25, %s1006_s25   ;;  %s805_s24 = sphi %s867_s24, %s1005_s24   ;;  %s801_s23 = sphi %s865_s23, %s1004_s23  }
   0x7   : > { %s32_s30 = sadd.s32 1, %s817_s27  ;;  %s181_s7 = sadd.s32 1, %s809_s25 }
   0x8   : > { %p34_p0 = scmp.ge.s32.totalorder %s32_s30, 2  ;;  %p191_p1 = scmp.ne.s32.totalorder %s809_s25, %s805_s24 }
   0x9   : > { %p192_p2 = scmp.eq.s32.totalorder %s645_s5, 1  ;;  %p197_p3 = scmp.ne.s32.totalorder %s805_s24, %s801_s23 }
   0xa   : > { %s1010_s30 = smov (%p34_p0, %s32_s30), 0  ;;  %p198_p5 = scmp.eq.s32.totalorder %s646_s29, 1 }
   0xb   : > { %p905_p4 = por %p192_p2, %p191_p1  ;;  %s176_s9 = ssub.s32 %s817_s27, %s1010_s30 }
   0xc   : > { %p649_p6 = scmp.ge.s32.totalorder %s821_s28, 1  ;;  %p179_p7 = scmp.eq.s32.totalorder %s176_s9, 0 }
   0xd   : > { %p912_p8 = por %p198_p5, %p197_p3  ;;  %p254_p9 = scmp.lt.s32.totalorder %s821_s28, 3 }
   0xe   : > { %s918_s11 = scalar_select %p179_p7, %s809_s25, %s181_s7  }
   0xf   : > { %p255_p10 = pnand %p649_p6, %p254_p9 }
  0x10   : > { %p298_p11 = scmp.lt.s32.totalorder (!%p255_p10), %s813_s26, 1  ;;  %v823_v0 = vmov (!%p255_p10), 0.0   ;;  %v484_v1 = vld [vmem:[%s999_s4] sm:$0xff] (!%p255_p10)  ;;  %v824_v2 = vmov (!%p255_p10), 0   ;;  %vm328_vm0 = vcmask (!%p255_p10), 1043456   ;;  %v825_v7 = vmov (!%p255_p10), 1  }
  0x11   : > { %258 = sbr.rel (%p255_p10) target bundleno = 313 (0x139), region = 44  ;;  %397 = vmatprep.mubr.f32.mxu1 (!%p255_p10), %v823_v0  ;;  %477 = vmatprep.mubr.f32.mxu0 (!%p255_p10), %v823_v0  ;;  %v321_v8 = vld [vmem:[%s998_s3] sm:$0xff] (!%p255_p10)  ;;  %vm324_vm1 = vcmask (!%p255_p10), 31744   ;;  %s512_s9 = sld [smem:[#allocation2]] (!%p255_p10) }
  0x12   : > { %731 = vset.pattern.permute.xlu0 (!%p255_p10), %v824_v2  ;;  %v320_v9 = vld [vmem:[%s997_s2] sm:$0xff] (!%p255_p10)  ;;  %s294_s12 = sand.u32 (!%p255_p10), 1, %s805_s24  }
  0x13   : > { %487 = vperm.xlu0 (!%p255_p10), %731, %v484_v1   ;;  %s650_s13 = sshll.u32 (!%p255_p10), %s294_s12, 3  ;;  %s535_s20 = scalar_lea.sflag (!%p255_p10), [#allocation4], %s294_s12 }
  0x17   : > { %732 = vset.pattern.permute.xlu0 (!%p255_p10), %v825_v7  ;;  %v513_v33 = vstv (!%p255_p10), %s512_s9 }
  0x18   : > { %s299_s14 = scalar_select %p298_p11, %s813_s26, 1  ;;  %495 = vperm.xlu0 %732, %v484_v1  }
  0x1a   : > { %s668_s15 = sshll.u32 %s299_s14, 3  ;;  %s670_s14 = sshll.u32 %s813_s26, 7 }
  0x1b   : > { %s315_s18 = scalar_lea.vmem %s996_s1, %s668_s15  ;;  %s305_s21 = scalar_lea.vmem %s995_s0, %s668_s15 }
  0x1c   : > { %v931_v3 = vld [vmem:[%s315_s18] sm:$0xff]  ;;  %s296_s15 = scalar_lea.vmem [#allocation3], %s650_s13  ;;  %s948_s19 = scalar_lea.hbm %s1001_s6, %s670_s14 }
  0x1d   : > { %v318_v4 = vld [vmem:[%s305_s21] sm:$0xff]  ;;  %v323_v5 = vcombine.high %v931_v3, %v931_v3  ;;  %s551_s16 = sshll.u32 %s296_s15, 4  ;;  %s826_s26 = smov [#allocation3]   ;;  %s950_s16 = int_to_ptr.vmem [resolvable:$true] %s551_s16 }
  0x1e   : > { %v405_v6 = vcombine.high %v318_v4, %v318_v4  ;;  %s743_s21 = scalar_lea.vmem %s950_s16, 128  ;;  %s747_s22 = sshll.u32 %s826_s26, 4  ;;  %s748_s22 = int_to_ptr.vmem [resolvable:$false] %s747_s22 }
  0x1f   : > { %655 = vmatprep.subr.msk.mxu1 %vm328_vm0, %v323_v5  ;;  %p744_p12 = scmp.ne.s32.totalorder %s950_s16, %s743_s21  ;;  %s749_s5 = scalar_lea.vmem %s748_s22, 256 }
  0x20   : > { %658 = vmatprep.subr.msk.mxu0 %vm328_vm0, %v405_v6  ;;  %656 = vmatpush1.msk.msra.mxu1 %vm328_vm0, %v931_v3  ;;  %p750_p1 = scmp.lt.s32.totalorder %s950_s16, %s748_s22  ;;  %p751_p2 = scmp.lt.s32.totalorder %s749_s5, %s743_s21 }
  0x21   : > { %659 = vmatpush1.msk.msra.mxu0 %vm328_vm0, %v318_v4  ;;  %657 = vmatmul.mubr.msk.f32.vlgmr.msra.gmra.mrb[0].mxu1 %vm324_vm1, %v321_v8  ;;  %p745_p13 = pnand %p744_p12, %p905_p4 }
  0x22   : > { %660 = vmatmul.mubr.msk.f32.vlgmr.msra.gmra.mrb[0].mxu0 %vm324_vm1, %v320_v9  ;;  %p752_p3 = por %p751_p2, %p750_p1 }
  0x23   : > { %p746_p0 = pneg %p745_p13 }
  0x25   : > { %p753_p5 = pnand %p752_p3, %p746_p0 }
  0x92   : > { %v488_v10 = vpop.permute.xlu0 %487 }
  0x97   : > { %v496_v19 = vpop.permute.xlu0 %495 }
  0xf4   : > { %v399_v11 = vpop.f32.mrb[0].mxu1 }
  0xf5   : > { %v479_v12 = vpop.f32.mrb[0].mxu0  ;;  %v401_v14 = vpop.f32.mrb[1].mxu1 }
  0xf6   : > { %v480_v13 = vadd.f32 %v479_v12, %v399_v11  ;;  %v481_v15 = vpop.f32.mrb[1].mxu0 }
  0xf7   : > { %v482_v16 = vadd.f32 %v481_v15, %v401_v14 }
  0xf8   : > { %v490_v17 = vadd.f32 %v488_v10, %v480_v13 }
  0xf9   : > { %v491_v18 = vadd.f32 %v488_v10, %v482_v16 }
  0xfa   : > { %v492_v20 = vmax.f32 %v490_v17, 0.0 }
  0xfb   : > { %v493_v21 = vmax.f32 %v491_v18, 0.0 }
  0xfc   : > { %v498_v22 = vmul.f32 %v496_v19, %v492_v20 }
  0xfd   : > { %v499_v23 = vmul.f32 %v496_v19, %v493_v21 }
  0xfe   : > { %v500_v24 = vrot.slane %v498_v22, 4 }
  0xff   : > { %v506_v25 = vrot.slane %v499_v23, 4 }
 0x100   : > { %v501_v26 = vadd.f32 %v500_v24, %v498_v22 }
 0x101   : > { %v507_v27 = vadd.f32 %v506_v25, %v499_v23 }
 0x102   : > { %v502_v28 = vrot.slane %v501_v26, 2 }
 0x103   : > { %v508_v29 = vrot.slane %v507_v27, 2 }
 0x104   : > { %v503_v30 = vadd.f32 %v502_v28, %v501_v26 }
 0x105   : > { %v509_v31 = vadd.f32 %v508_v29, %v507_v27 }
 0x106   : > { %v504_v32 = vrot.slane %v503_v30, 1 }
 0x107   : > { %v510_v34 = vrot.slane %v509_v31, 1 }
 0x108   : > { %v505_v35 = vadd.f32 %v504_v32, %v503_v30 }
 0x109   : > { %v511_v36 = vadd.f32 %v510_v34, %v509_v31 }
 0x10a   : > { %v514_v37 = vadd.f32 %v513_v33, %v505_v35 }
 0x10b   : > { %v515_v38 = vadd.f32 %v513_v33, %v511_v36 }
 0x10c   : > { %v661_v39 = vmul.f32 -1.442695, %v514_v37 }
 0x10d   : > { %v662_v40 = vmul.f32 -1.442695, %v515_v38 }
 0x10e   : > { %735 = vpow2.f32 %v661_v39 }
 0x10f   : > { %737 = vpow2.f32 %v662_v40 }
 0x118   : > { %v736_v41 = vpop.eup %735 }
 0x119   : > { %v738_v42 = vpop.eup %737  ;;  %v522_v43 = vadd.f32 1.0, %v736_v41 }
 0x11a   : > { %v523_v44 = vadd.f32 1.0, %v738_v42 }
 0x11b   : > { %739 = vrcp.f32 %v522_v43 }
 0x11c   : > { %741 = vrcp.f32 %v523_v44 }
 0x125   : > { %v740_v45 = vpop.eup %739 }
 0x126   : > { %v742_v46 = vpop.eup %741 }
 0x127   : > { %v530_v47 = vcombine.low %v740_v45, %v742_v46 }
 0x129   : > { %v532_v48 = vmul.f32 %v530_v47, %v931_v3 }
 0x12b   : > { %533 = vst [vmem:[%s296_s15] sm:$0xff] %v532_v48 }
 0x12c   : > { %756 = shalt.err (!%p753_p5)
}
 0x12d   : > { %s757_s29 = scalar_lea.hbm %s948_s19, 128  ;;  %s761_s12 = scalar_lea.hbm %s1001_s6, 256 }
 0x12e   : > { %p758_p6 = scmp.ne.s32.totalorder %s948_s19, %s757_s29  ;;  %p762_p10 = scmp.lt.u32.totalorder %s948_s19, %s1001_s6 }
 0x12f   : > { %p763_p11 = scmp.lt.u32.totalorder %s761_s12, %s757_s29  ;;  %p765_p13 = scmp.lt.u32.totalorder %s757_s29, %s948_s19 }
 0x130   : > { %p759_p7 = pnand %p758_p6, %p905_p4 }
 0x131   : > { %p764_p12 = por %p763_p11, %p762_p10 }
 0x132   : > { %p760_p9 = pneg %p759_p7 }
 0x133   : > { %p766_p0 = por %p765_p13, %p764_p12 }
 0x135   : > { %p767_p1 = pnand %p766_p0, %p760_p9 }
 0x137   : > { %770 = shalt.err (!%p767_p1)
}
 0x138   : > { %673 = dma.vmem_to_hbm [thread:$0]  (%p905_p4), %s950_s16, 128, %s948_s19, %s535_s20  }
 0x139 PF: > { %p679_p2 = scmp.ge.s32.totalorder %s821_s28, 2  ;;  %s563_s15 = sand.u32 1, %s801_s23  }
 0x13a   : > { %s564_s17 = scalar_lea.sflag [#allocation4], %s563_s15 }
 0x13b   : > { %p676_p3 = pnand %p679_p2, %p912_p8 }
 0x13d   : > { %796 = dma.done.wait (!%p676_p3), %s564_s17, 128  }
 0x13e   : > { %798 = vsyncadd (!%p676_p3), %s564_s17, 4294967168  ;;  %s20_s28 = sadd.s32 1, %s821_s28   ;;  %s1004_s23 = smov %s805_s24 }
 0x13f   : > { %p17_p5 = scmp.ge.s32.totalorder %s20_s28, 4   ;;  %s1005_s24 = smov %s809_s25 }
 0x140   : > { %s1006_s25 = smov %s918_s11  ;;  %s1007_s26 = smov %s817_s27 }
 0x141   : > { %s1008_s27 = smov %s1010_s30  ;;  %19 = sbr.rel (!%p17_p5) target bundleno = 6 (0x6), region = 82 }
 0x148   :  { %569 = vsyncpa [#allocation4], 1 }
 0x149   :  { %571 = vsyncpa [#allocation4 + $0x1], 1 }

</bundles_post_ra>
